<compile_context>
chip_gen: v5e
topology: v5e:2x2
jax: 0.10.0
libtpu: 0.0.40
codegen_flags: <defaults>
</compile_context>

<pallas_src>
import functools

import jax
import jax.numpy as jnp
from jax.experimental import pallas as pl
from jax.experimental.pallas import tpu as pltpu


def _round_up(x, m):
    return (x + m - 1) // m * m


def _pad2d(a, rows, cols):
    r, c = a.shape
    return jnp.pad(a, ((0, rows - r), (0, cols - c)))


def _med_kernel(x_ref, wenc_ref, benc_ref, wpre_ref, bpre_ref,
                wlin_ref, blin_ref, out_ref):
    """One row-tile of the fused forward. bf16 MXU operands, f32 accumulate."""
    # --- packed encoders: z = relu(x @ W_blockdiag + b) ---
    z = jnp.dot(x_ref[...], wenc_ref[...], preferred_element_type=jnp.float32)
    z = jnp.maximum(z + benc_ref[...], 0.0)

    # --- decoder.pre_linear: h = relu(z @ W_pre + b_pre) ---
    h = jnp.dot(z.astype(wpre_ref.dtype), wpre_ref[...],
                preferred_element_type=jnp.float32)
    h = jnp.maximum(h + bpre_ref[...], 0.0)

    # --- decoder.linear (no activation) ---
    o = jnp.dot(h.astype(wlin_ref.dtype), wlin_ref[...],
                preferred_element_type=jnp.float32)
    out_ref[...] = (o + blin_ref[...]).astype(out_ref.dtype)


@functools.partial(jax.jit, static_argnames=("block_rows",))
def multi_encoder_decoder(xs, enc_params, pre_w, pre_b, lin_w, lin_b,
                          *, block_rows=256):
    """Fused MultiEncoderDecoder forward.

    xs:         list of (B, in_dim_i) f32 arrays (one per encoder).
    enc_params: list of (W (in_dim_i, latent_i), b (1, latent_i)) f32 pairs.
    pre_w:      (total_latent, total_latent) f32;  pre_b: (1, total_latent).
    lin_w:      (total_latent, out_dim) f32;       lin_b: (1, out_dim).
    """
    assert len(xs) == len(enc_params), "one input per encoder required"
    B = xs[0].shape[0]
    in_dims = [x.shape[1] for x in xs]
    lat_dims = [w.shape[1] for (w, _) in enc_params]
    for x, (w, _) in zip(xs, enc_params):
        assert x.shape == (B, w.shape[0]), "encoder input/weight mismatch"
    total_in = sum(in_dims)
    total_latent = sum(lat_dims)
    out_dim = lin_w.shape[1]
    assert pre_w.shape == (total_latent, total_latent)
    assert lin_w.shape[0] == total_latent

    # ---- lane-padded sizes (multiples of 128) and row tile (multiple of 8) ----
    K_pad = _round_up(total_in, 128)
    L_pad = _round_up(total_latent, 128)
    N_pad = _round_up(out_dim, 128)
    tm = min(block_rows, _round_up(B, 8))
    B_pad = _round_up(B, tm)

    # ---- host-side packing: inputs, block-diagonal encoder weight, biases ----
    x_packed = jnp.concatenate(xs, axis=-1)                       # (B, total_in)
    x_packed = _pad2d(x_packed, B_pad, K_pad).astype(jnp.bfloat16)

    wenc = jnp.zeros((K_pad, L_pad), jnp.float32)
    benc = jnp.zeros((1, L_pad), jnp.float32)
    off_i, off_l = 0, 0
    for (w, b) in enc_params:
        di, dl = w.shape
        wenc = wenc.at[off_i:off_i + di, off_l:off_l + dl].set(w)
        benc = benc.at[:, off_l:off_l + dl].set(b)
        off_i += di
        off_l += dl
    wenc = wenc.astype(jnp.bfloat16)

    wpre = _pad2d(pre_w, L_pad, L_pad).astype(jnp.bfloat16)
    bpre = _pad2d(pre_b, 1, L_pad)
    wlin = _pad2d(lin_w, L_pad, N_pad).astype(jnp.bfloat16)
    blin = _pad2d(lin_b, 1, N_pad)

    # ---- grid / specs: batch-tiled activations, resident weights ----
    grid = (B_pad // tm,)
    x_spec = pl.BlockSpec((tm, K_pad), lambda i: (i, 0))
    out_spec = pl.BlockSpec((tm, N_pad), lambda i: (i, 0))

    def resident(shape):
        return pl.BlockSpec(shape, lambda i: (0, 0))

    weight_bytes = (wenc.size + wpre.size + wlin.size) * 2 \
        + (benc.size + bpre.size + blin.size) * 4
    act_bytes = 2 * (tm * K_pad * 2) + 2 * (tm * N_pad * 4)   # double-buffered tiles
    inter_bytes = 4 * tm * L_pad * 4                           # z/h headroom
    vmem_limit = int(min(64 * 1024 * 1024,
                         max(16 * 1024 * 1024,
                             4 * (weight_bytes + act_bytes + inter_bytes))))

    flops = 2 * B_pad * (K_pad * L_pad + L_pad * L_pad + L_pad * N_pad)
    bytes_accessed = (x_packed.size * 2 + weight_bytes + B_pad * N_pad * 4)

    out_padded = pl.pallas_call(
        _med_kernel,
        out_shape=jax.ShapeDtypeStruct((B_pad, N_pad), jnp.float32),
        grid=grid,
        in_specs=[
            x_spec,
            resident((K_pad, L_pad)), resident((1, L_pad)),
            resident((L_pad, L_pad)), resident((1, L_pad)),
            resident((L_pad, N_pad)), resident((1, N_pad)),
        ],
        out_specs=out_spec,
        compiler_params=pltpu.CompilerParams(
            dimension_semantics=("parallel",),
            vmem_limit_bytes=vmem_limit),
        cost_estimate=pl.CostEstimate(
            flops=flops, transcendentals=0, bytes_accessed=bytes_accessed),
    )(x_packed, wenc, benc, wpre, bpre, wlin, blin)

    return out_padded[:B, :out_dim]


# ----------------------------- reference + demo -----------------------------

def _init_linear(key, in_dim, out_dim):
    """Deterministic init mimicking torch.nn.Linear (uniform +/- 1/sqrt(in))."""
    kw, kb = jax.random.split(key)
    bound = 1.0 / jnp.sqrt(jnp.float32(in_dim))
    w = jax.random.uniform(kw, (in_dim, out_dim), jnp.float32, -bound, bound)
    b = jax.random.uniform(kb, (1, out_dim), jnp.float32, -bound, bound)
    return w, b


def _reference(xs, enc_params, pre_w, pre_b, lin_w, lin_b,
               mxu_dtype=jnp.float32):
    def mm(a, w):
        return jnp.dot(a.astype(mxu_dtype), w.astype(mxu_dtype),
                       preferred_element_type=jnp.float32)
    zs = [jnp.maximum(mm(x, w) + b, 0.0) for x, (w, b) in zip(xs, enc_params)]
    z = jnp.concatenate(zs, axis=-1)
    h = jnp.maximum(mm(z, pre_w) + pre_b, 0.0)
    return mm(h, lin_w) + lin_b


if __name__ == "__main__":
    # 3 encoders with different input dims, shared latent dim, one decoder.
    input_dims = [16, 24, 32]
    latent_dim = 32
    output_dim = 16
    batch = 512          # exercises the row-tiled grid (2 tiles of 256)

    key = jax.random.PRNGKey(0)
    keys = jax.random.split(key, 2 + 2 * len(input_dims))

    xs = [jax.random.normal(keys[i], (batch, d), jnp.float32)
          for i, d in enumerate(input_dims)]

    enc_params = [_init_linear(keys[len(input_dims) + i], d, latent_dim)
                  for i, d in enumerate(input_dims)]

    total_latent = len(input_dims) * latent_dim
    pre_w, pre_b = _init_linear(keys[-2], total_latent, total_latent)
    lin_w, lin_b = _init_linear(keys[-1], total_latent, output_dim)

    out = multi_encoder_decoder(xs, enc_params, pre_w, pre_b, lin_w, lin_b)
    out = jax.block_until_ready(out)
    assert out.shape == (batch, output_dim)

    # Exact-path check: reference with the same bf16 MXU operand dtype.
    ref_bf16 = _reference(xs, enc_params, pre_w, pre_b, lin_w, lin_b,
                          mxu_dtype=jnp.bfloat16)
    assert jnp.allclose(out, ref_bf16, atol=2e-3, rtol=2e-3), \
        "mismatch vs bf16-operand reference"

    # Semantics check: full-f32 reference, tolerance covers bf16 rounding.
    ref_f32 = _reference(xs, enc_params, pre_w, pre_b, lin_w, lin_b)
    assert jnp.allclose(out, ref_f32, atol=5e-2, rtol=5e-2), \
        "mismatch vs f32 reference"

    print("KERNEL_OK")
</pallas_src>

<mosaic_0001>
module attributes {stable_mosaic.version = 11 : i64} {
  func.func @_med_kernel(%arg0: i32, %arg1: memref<256x128xbf16, #tpu.memory_space<vmem>>, %arg2: memref<128x128xbf16, #tpu.memory_space<vmem>>, %arg3: memref<1x128xf32, #tpu.memory_space<vmem>>, %arg4: memref<128x128xbf16, #tpu.memory_space<vmem>>, %arg5: memref<1x128xf32, #tpu.memory_space<vmem>>, %arg6: memref<128x128xbf16, #tpu.memory_space<vmem>>, %arg7: memref<1x128xf32, #tpu.memory_space<vmem>>, %arg8: memref<256x128xf32, #tpu.memory_space<vmem>>) attributes {dimension_semantics = [#tpu.dimension_semantics<parallel>], iteration_bounds = array<i64: 2>, scalar_prefetch = 0 : i64, scratch_operands = 0 : i64, tpu.core_type = #tpu.core_type<tc>, window_params = [{transform_indices = @transform_0, window_bounds = array<i64: 256, 128>}, {pipeline_mode = #tpu.pipeline_mode<synchronous>, transform_indices = @transform_1, window_bounds = array<i64: 128, 128>}, {pipeline_mode = #tpu.pipeline_mode<synchronous>, transform_indices = @transform_2, window_bounds = array<i64: 1, 128>}, {pipeline_mode = #tpu.pipeline_mode<synchronous>, transform_indices = @transform_3, window_bounds = array<i64: 128, 128>}, {pipeline_mode = #tpu.pipeline_mode<synchronous>, transform_indices = @transform_4, window_bounds = array<i64: 1, 128>}, {pipeline_mode = #tpu.pipeline_mode<synchronous>, transform_indices = @transform_5, window_bounds = array<i64: 128, 128>}, {pipeline_mode = #tpu.pipeline_mode<synchronous>, transform_indices = @transform_6, window_bounds = array<i64: 1, 128>}, {transform_indices = @transform_7, window_bounds = array<i64: 256, 128>}]} {
    %c0 = arith.constant 0 : index
    %c0_0 = arith.constant 0 : index
    %0 = vector.load %arg1[%c0, %c0_0] : memref<256x128xbf16, #tpu.memory_space<vmem>>, vector<256x128xbf16>
    %c0_1 = arith.constant 0 : index
    %c0_2 = arith.constant 0 : index
    %1 = vector.load %arg2[%c0_1, %c0_2] : memref<128x128xbf16, #tpu.memory_space<vmem>>, vector<128x128xbf16>
    %cst = arith.constant dense<0.000000e+00> : vector<256x128xf32>
    %2 = tpu.matmul %0, %1, %cst {dimension_numbers = #tpu.dot_dimension_numbers<[1], [0], [0], [1], [0, 0, 1, 1], [], []>} : vector<256x128xbf16>, vector<128x128xbf16>, vector<256x128xf32> -> vector<256x128xf32>
    %c0_3 = arith.constant 0 : index
    %c0_4 = arith.constant 0 : index
    %3 = vector.load %arg3[%c0_3, %c0_4] : memref<1x128xf32, #tpu.memory_space<vmem>>, vector<1x128xf32>
    %4 = vector.broadcast %3 : vector<1x128xf32> to vector<256x128xf32>
    %5 = arith.addf %2, %4 : vector<256x128xf32>
    %cst_5 = arith.constant 0.000000e+00 : f32
    %6 = vector.broadcast %cst_5 : f32 to vector<256x128xf32>
    %7 = arith.maximumf %5, %6 : vector<256x128xf32>
    %8 = arith.truncf %7 : vector<256x128xf32> to vector<256x128xbf16>
    %c0_6 = arith.constant 0 : index
    %c0_7 = arith.constant 0 : index
    %9 = vector.load %arg4[%c0_6, %c0_7] : memref<128x128xbf16, #tpu.memory_space<vmem>>, vector<128x128xbf16>
    %cst_8 = arith.constant dense<0.000000e+00> : vector<256x128xf32>
    %10 = tpu.matmul %8, %9, %cst_8 {dimension_numbers = #tpu.dot_dimension_numbers<[1], [0], [0], [1], [0, 0, 1, 1], [], []>} : vector<256x128xbf16>, vector<128x128xbf16>, vector<256x128xf32> -> vector<256x128xf32>
    %c0_9 = arith.constant 0 : index
    %c0_10 = arith.constant 0 : index
    %11 = vector.load %arg5[%c0_9, %c0_10] : memref<1x128xf32, #tpu.memory_space<vmem>>, vector<1x128xf32>
    %12 = vector.broadcast %11 : vector<1x128xf32> to vector<256x128xf32>
    %13 = arith.addf %10, %12 : vector<256x128xf32>
    %cst_11 = arith.constant 0.000000e+00 : f32
    %14 = vector.broadcast %cst_11 : f32 to vector<256x128xf32>
    %15 = arith.maximumf %13, %14 : vector<256x128xf32>
    %16 = arith.truncf %15 : vector<256x128xf32> to vector<256x128xbf16>
    %c0_12 = arith.constant 0 : index
    %c0_13 = arith.constant 0 : index
    %17 = vector.load %arg6[%c0_12, %c0_13] : memref<128x128xbf16, #tpu.memory_space<vmem>>, vector<128x128xbf16>
    %cst_14 = arith.constant dense<0.000000e+00> : vector<256x128xf32>
    %18 = tpu.matmul %16, %17, %cst_14 {dimension_numbers = #tpu.dot_dimension_numbers<[1], [0], [0], [1], [0, 0, 1, 1], [], []>} : vector<256x128xbf16>, vector<128x128xbf16>, vector<256x128xf32> -> vector<256x128xf32>
    %c0_15 = arith.constant 0 : index
    %c0_16 = arith.constant 0 : index
    %19 = vector.load %arg7[%c0_15, %c0_16] : memref<1x128xf32, #tpu.memory_space<vmem>>, vector<1x128xf32>
    %20 = vector.broadcast %19 : vector<1x128xf32> to vector<256x128xf32>
    %21 = arith.addf %18, %20 : vector<256x128xf32>
    %c0_17 = arith.constant 0 : index
    %c0_18 = arith.constant 0 : index
    %22 = vector.load %arg8[%c0_17, %c0_18] : memref<256x128xf32, #tpu.memory_space<vmem>>, vector<256x128xf32>
    tpu.vector_store %arg8[%c0_17, %c0_18], %21 {strides = array<i32>} : memref<256x128xf32, #tpu.memory_space<vmem>>, vector<256x128xf32>,
    return
  }
  func.func @transform_0(%arg0: i32) -> (i32, i32) {
    %c0_i32 = arith.constant 0 : i32
    %c0_i32_0 = arith.constant 0 : i32
    return %arg0, %c0_i32 : i32, i32
  }
  func.func @transform_1(%arg0: i32) -> (i32, i32) {
    %c0_i32 = arith.constant 0 : i32
    %c0_i32_0 = arith.constant 0 : i32
    %c0_i32_1 = arith.constant 0 : i32
    return %c0_i32, %c0_i32_0 : i32, i32
  }
  func.func @transform_2(%arg0: i32) -> (i32, i32) {
    %c0_i32 = arith.constant 0 : i32
    %c0_i32_0 = arith.constant 0 : i32
    %c0_i32_1 = arith.constant 0 : i32
    return %c0_i32, %c0_i32_0 : i32, i32
  }
  func.func @transform_3(%arg0: i32) -> (i32, i32) {
    %c0_i32 = arith.constant 0 : i32
    %c0_i32_0 = arith.constant 0 : i32
    %c0_i32_1 = arith.constant 0 : i32
    return %c0_i32, %c0_i32_0 : i32, i32
  }
  func.func @transform_4(%arg0: i32) -> (i32, i32) {
    %c0_i32 = arith.constant 0 : i32
    %c0_i32_0 = arith.constant 0 : i32
    %c0_i32_1 = arith.constant 0 : i32
    return %c0_i32, %c0_i32_0 : i32, i32
  }
  func.func @transform_5(%arg0: i32) -> (i32, i32) {
    %c0_i32 = arith.constant 0 : i32
    %c0_i32_0 = arith.constant 0 : i32
    %c0_i32_1 = arith.constant 0 : i32
    return %c0_i32, %c0_i32_0 : i32, i32
  }
  func.func @transform_6(%arg0: i32) -> (i32, i32) {
    %c0_i32 = arith.constant 0 : i32
    %c0_i32_0 = arith.constant 0 : i32
    %c0_i32_1 = arith.constant 0 : i32
    return %c0_i32, %c0_i32_0 : i32, i32
  }
  func.func @transform_7(%arg0: i32) -> (i32, i32) {
    %c0_i32 = arith.constant 0 : i32
    %c0_i32_0 = arith.constant 0 : i32
    return %arg0, %c0_i32 : i32, i32
  }
}

</mosaic_0001>

<bundles_post_ra>
// kernel: multi_encoder_decoder.1
= control target key start
LH: loop header
LB: loop body
LE: loop exit
PB: predicated region body
PF: predicated region fallthrough
CT: control target
= control target key end

     0   :  { %s1359_s24 = smov 0   ;;  %s1615_s0 = inlined_call_operand.vmem [shape: bf16[512,128], index: 0, kind: input, shape index: {}]   ;;  %s1616_s1 = inlined_call_operand.vmem [shape: bf16[128,128], index: 1, kind: input, shape index: {}]   ;;  %s1617_s2 = inlined_call_operand.vmem [shape: f32[1,128], index: 2, kind: input, shape index: {}]   ;;  %s1618_s3 = inlined_call_operand.vmem [shape: bf16[128,128], index: 3, kind: input, shape index: {}]   ;;  %s1619_s4 = inlined_call_operand.vmem [shape: f32[1,128], index: 4, kind: input, shape index: {}]   ;;  %s1620_s5 = inlined_call_operand.vmem [shape: bf16[128,128], index: 5, kind: input, shape index: {}]   ;;  %s1621_s6 = inlined_call_operand.vmem [shape: f32[1,128], index: 6, kind: input, shape index: {}]   ;;  %s1622_s7 = inlined_call_operand.vmem [shape: f32[512,128], index: 7, kind: output, shape index: {}]  }
   0x1 LB: > { %s1065_s25 = sadd.s32 4294967295, %s1317_s24   ;;  %p1069_p0 = scmp.ge.s32.totalorder %s1317_s24, 1  ;;  %s1317_s24 = sphi %s1359_s24, %s17_s24  }
   0x2   : > { %p238_p1 = scmp.lt.s32.totalorder %s1317_s24, 3 }
   0x4   : > { %p239_p2 = pnand %p1069_p0, %p238_p1 }
   0x5   : > { %s1070_s11 = sshll.u32 (!%p239_p2), %s1065_s25, 5 }
   0x6   : > { %242 = sbr.rel (%p239_p2) target bundleno = 642 (0x282), region = 48  ;;  %p271_p3 = scmp.lt.s32.totalorder (!%p239_p2), %s1070_s11, 63 }
   0xb   : > { %v1259_v0 = vld [vmem:[%s1616_s1 + $0x38] sm:$0xff]  ;;  %v1258_v1 = vld [vmem:[%s1616_s1 + $0x30] sm:$0xff]  ;;  %v1257_v2 = vld [vmem:[%s1616_s1 + $0x28] sm:$0xff]  ;;  %s1624_s11 = smov (!%p271_p3, %s1070_s11), 63 }
   0xc   : > { %478 = vmatpush.bf16.msra.mxu0 %v1259_v0  ;;  %1276 = vmatpush.bf16.msra.mxu3 %v1259_v0  ;;  %v1256_v3 = vld [vmem:[%s1616_s1 + $0x20] sm:$0xff]  ;;  %v1255_v4 = vld [vmem:[%s1616_s1 + $0x18] sm:$0xff]  ;;  %v1254_v5 = vld [vmem:[%s1616_s1 + $0x10] sm:$0xff]  ;;  %s1071_s18 = sshll.u32 %s1624_s11, 2 }
   0xd   : > { %v1253_v6 = vld [vmem:[%s1616_s1 + $0x8] sm:$0xff]  ;;  %v1252_v7 = vld [vmem:[%s1616_s1] sm:$0xff]  ;;  %s1397_s23 = scalar_lea.vmem %s1615_s0, %s1071_s18  ;;  %v1267_v15 = vld [vmem:[%s1618_s3 + $0x38] sm:$0xff]  ;;  %s1073_s18 = sshll.u32 %s1624_s11, 3 }
   0xe   : > { %v1236_v8 = vld [vmem:[%s1397_s23] sm:$0xff]  ;;  %v1237_v9 = vld [vmem:[%s1397_s23 + $0x8] sm:$0xff]  ;;  %v1238_v10 = vld [vmem:[%s1397_s23 + $0x10] sm:$0xff]  ;;  %683 = vmatpush.bf16.msra.mxu1 %v1267_v15 }
   0xf   : > { %v1239_v11 = vld [vmem:[%s1397_s23 + $0x18] sm:$0xff]  ;;  %v1248_v12 = vld [vmem:[%s1397_s23 + $0x60] sm:$0xff]  ;;  %v1249_v14 = vld [vmem:[%s1397_s23 + $0x68] sm:$0xff] }
  0x10   : > { %479 = vmatpush.bf16.msra.mxu0 %v1258_v1  ;;  %1277 = vmatpush.bf16.msra.mxu3 %v1258_v1  ;;  %v1240_v13 = vld [vmem:[%s1397_s23 + $0x20] sm:$0xff]  ;;  %v1241_v16 = vld [vmem:[%s1397_s23 + $0x28] sm:$0xff]  ;;  %v1266_v17 = vld [vmem:[%s1618_s3 + $0x30] sm:$0xff] }
  0x11   : > { %v1250_v18 = vld [vmem:[%s1397_s23 + $0x70] sm:$0xff]  ;;  %v1265_v19 = vld [vmem:[%s1618_s3 + $0x28] sm:$0xff]  ;;  %v1264_v20 = vld [vmem:[%s1618_s3 + $0x20] sm:$0xff] }
  0x12   : > { %684 = vmatpush.bf16.msra.mxu1 %v1266_v17  ;;  %v1263_v21 = vld [vmem:[%s1618_s3 + $0x18] sm:$0xff]  ;;  %v1242_v22 = vld [vmem:[%s1397_s23 + $0x30] sm:$0xff]  ;;  %v1261_v24 = vld [vmem:[%s1618_s3 + $0x8] sm:$0xff] }
  0x13   : > { %v1262_v23 = vld [vmem:[%s1618_s3 + $0x10] sm:$0xff]  ;;  %v1260_v25 = vld [vmem:[%s1618_s3] sm:$0xff]  ;;  %v1251_v26 = vld [vmem:[%s1397_s23 + $0x78] sm:$0xff] }
  0x14   : > { %480 = vmatpush.bf16.msra.mxu0 %v1257_v2  ;;  %1278 = vmatpush.bf16.msra.mxu3 %v1257_v2  ;;  %v1243_v27 = vld [vmem:[%s1397_s23 + $0x38] sm:$0xff]  ;;  %v1244_v28 = vld [vmem:[%s1397_s23 + $0x40] sm:$0xff]  ;;  %v1245_v37 = vld [vmem:[%s1397_s23 + $0x48] sm:$0xff] }
  0x15   : > { %v1439_v30 = vld [vmem:[%s1617_s2] ss:$0 sm:$0xff]  ;;  %v1246_v45 = vld [vmem:[%s1397_s23 + $0x50] sm:$0xff]  ;;  %v1247_v53 = vld [vmem:[%s1397_s23 + $0x58] sm:$0xff]  ;;  %s1540_s23 = scalar_lea.vmem %s1622_s7, %s1073_s18 }
  0x16   : > { %685 = vmatpush.bf16.msra.mxu1 %v1265_v19 }
  0x18   : > { %481 = vmatpush.bf16.msra.mxu0 %v1256_v3  ;;  %1279 = vmatpush.bf16.msra.mxu3 %v1256_v3 }
  0x1a   : > { %686 = vmatpush.bf16.msra.mxu1 %v1264_v20 }
  0x1c   : > { %482 = vmatpush.bf16.msra.mxu0 %v1255_v4  ;;  %1280 = vmatpush.bf16.msra.mxu3 %v1255_v4 }
  0x1e   : > { %687 = vmatpush.bf16.msra.mxu1 %v1263_v21 }
  0x20   : > { %483 = vmatpush.bf16.msra.mxu0 %v1254_v5  ;;  %1281 = vmatpush.bf16.msra.mxu3 %v1254_v5 }
  0x22   : > { %688 = vmatpush.bf16.msra.mxu1 %v1262_v23 }
  0x24   : > { %484 = vmatpush.bf16.msra.mxu0 %v1253_v6  ;;  %1282 = vmatpush.bf16.msra.mxu3 %v1253_v6 }
  0x26   : > { %689 = vmatpush.bf16.msra.mxu1 %v1261_v24 }
  0x28   : > { %485 = vmatpush.bf16.msra.mxu0 %v1252_v7  ;;  %1283 = vmatpush.bf16.msra.mxu3 %v1252_v7 }
  0x2a   : > { %690 = vmatpush.bf16.msra.mxu1 %v1260_v25 }
  0x2b   : > { %486 = vmatmul.bf16.vlgmr.msra.gmra.mxu0 %v1236_v8  ;;  %546 = vmatmul.bf16.vlgmr.msra.gmra.mxu3 %v1248_v12 }
  0x2c   : > { %1284 = vmatpush.bf16.msrb.mxu3 %v1267_v15 }
  0x30   : > { %1285 = vmatpush.bf16.msrb.mxu3 %v1266_v17 }
  0x34   : > { %1286 = vmatpush.bf16.msrb.mxu3 %v1265_v19 }
  0x38   : > { %1287 = vmatpush.bf16.msrb.mxu3 %v1264_v20 }
  0x3b   : > { %491 = vmatmul.bf16.gmra.mxu0 %v1237_v9  ;;  %551 = vmatmul.bf16.gmra.mxu3 %v1249_v14 }
  0x3c   : > { %1288 = vmatpush.bf16.msrb.mxu3 %v1263_v21 }
  0x40   : > { %1289 = vmatpush.bf16.msrb.mxu3 %v1262_v23 }
  0x44   : > { %1290 = vmatpush.bf16.msrb.mxu3 %v1261_v24 }
  0x48   : > { %1291 = vmatpush.bf16.msrb.mxu3 %v1260_v25  ;;  %v1274_v25 = vld [vmem:[%s1620_s5 + $0x30] sm:$0xff] }
  0x4b   : > { %496 = vmatmul.bf16.gmra.mxu0 %v1238_v10  ;;  %556 = vmatmul.bf16.gmra.mxu3 %v1250_v18  ;;  %v1275_v18 = vld [vmem:[%s1620_s5 + $0x38] sm:$0xff] }
  0x4c   : > { %888 = vmatpush.bf16.msra.mxu2 %v1275_v18  ;;  %1292 = vmatpush.bf16.msra.mxu3 %v1275_v18 }
  0x50   : > { %889 = vmatpush.bf16.msra.mxu2 %v1274_v25  ;;  %1293 = vmatpush.bf16.msra.mxu3 %v1274_v25 }
  0x5b   : > { %501 = vmatmul.bf16.gmra.mxu0 %v1239_v11  ;;  %561 = vmatmul.bf16.gmra.mxu3 %v1251_v26 }
  0x6b   : > { %506 = vmatmul.bf16.gmra.mxu0 %v1240_v13 }
  0x7b   : > { %511 = vmatmul.bf16.gmra.mxu0 %v1241_v16 }
  0x8b   : > { %516 = vmatmul.bf16.gmra.mxu0 %v1242_v22 }
  0x9b   : > { %521 = vmatmul.bf16.gmra.mxu0 %v1243_v27 }
  0xa8   : > { %v487_v29 = vpop.f32.mrf.mxu0 }
  0xa9   : > { %v488_v31 = vadd.f32 %v1439_v30, %v487_v29  ;;  %v1273_v29 = vld [vmem:[%s1620_s5 + $0x28] sm:$0xff] }
  0xaa   : > { %890 = vmatpush.bf16.msra.mxu2 %v1273_v29  ;;  %1294 = vmatpush.bf16.msra.mxu3 %v1273_v29 }
  0xab   : > { %526 = vmatmul.bf16.gmra.mxu0 %v1244_v28  ;;  %v567_v34 = vmax.f32 %v488_v31, 0.0  ;;  %v1272_v31 = vld [vmem:[%s1620_s5 + $0x20] sm:$0xff] }
  0xae   : > { %v547_v62 = vpop.f32.mrf.mxu3  ;;  %891 = vmatpush.bf16.msra.mxu2 %v1272_v31  ;;  %1295 = vmatpush.bf16.msra.mxu3 %v1272_v31 }
  0xaf   : > { %v548_v0 = vadd.f32 %v1439_v30, %v547_v62 }
  0xb0   : > { %v489_v32 = vpop.f32.mrf.mxu0 }
  0xb1   : > { %v490_v33 = vadd.f32 %v1439_v30, %v489_v32  ;;  %v591_v6 = vmax.f32 %v548_v0, 0.0 }
  0xb3   : > { %v568_v35 = vmax.f32 %v490_v33, 0.0 }
  0xb5   : > { %v599_v36 = vpack.c.bf16 %v568_v35, %v567_v34 }
  0xb6   : > { %v549_v3 = vpop.f32.mrf.mxu3 }
  0xb7   : > { %691 = vmatmul.bf16.vlgmr.msra.gmra.mxu1 %v599_v36  ;;  %v550_v7 = vadd.f32 %v1439_v30, %v549_v3 }
  0xb8   : > { %v492_v38 = vpop.f32.mrf.mxu0 }
  0xb9   : > { %v493_v39 = vadd.f32 %v1439_v30, %v492_v38  ;;  %v592_v9 = vmax.f32 %v550_v7, 0.0 }
  0xbb   : > { %531 = vmatmul.bf16.gmra.mxu0 %v1245_v37  ;;  %v569_v42 = vmax.f32 %v493_v39, 0.0  ;;  %v611_v10 = vpack.c.bf16 %v592_v9, %v591_v6  ;;  %v1271_v37 = vld [vmem:[%s1620_s5 + $0x18] sm:$0xff]  ;;  %v1497_v6 = vld [vmem:[%s1619_s4] ss:$0 sm:$0xff] }
  0xbc   : > { %892 = vmatpush.bf16.msra.mxu2 %v1271_v37  ;;  %1296 = vmatpush.bf16.msra.mxu3 %v1271_v37 }
  0xbd   : > { %751 = vmatmul.bf16.vlgmr.msrb.gmra.mxu3 %v611_v10 }
  0xbe   : > { %v552_v12 = vpop.f32.mrf.mxu3 }
  0xbf   : > { %v553_v14 = vadd.f32 %v1439_v30, %v552_v12 }
  0xc0   : > { %v494_v40 = vpop.f32.mrf.mxu0 }
  0xc1   : > { %v495_v41 = vadd.f32 %v1439_v30, %v494_v40  ;;  %v593_v21 = vmax.f32 %v553_v14, 0.0 }
  0xc3   : > { %v570_v43 = vmax.f32 %v495_v41, 0.0 }
  0xc5   : > { %v600_v44 = vpack.c.bf16 %v570_v43, %v569_v42 }
  0xc6   : > { %v554_v17 = vpop.f32.mrf.mxu3 }
  0xc7   : > { %696 = vmatmul.bf16.gmra.mxu1 %v600_v44  ;;  %v555_v22 = vadd.f32 %v1439_v30, %v554_v17  ;;  %v1270_v44 = vld [vmem:[%s1620_s5 + $0x10] sm:$0xff] }
  0xc8   : > { %v497_v46 = vpop.f32.mrf.mxu0  ;;  %893 = vmatpush.bf16.msra.mxu2 %v1270_v44  ;;  %1297 = vmatpush.bf16.msra.mxu3 %v1270_v44 }
  0xc9   : > { %v498_v47 = vadd.f32 %v1439_v30, %v497_v46  ;;  %v594_v24 = vmax.f32 %v555_v22, 0.0 }
  0xcb   : > { %536 = vmatmul.bf16.gmra.mxu0 %v1246_v45  ;;  %v571_v50 = vmax.f32 %v498_v47, 0.0  ;;  %v612_v26 = vpack.c.bf16 %v594_v24, %v593_v21 }
  0xcd   : > { %756 = vmatmul.bf16.gmra.mxu3 %v612_v26 }
  0xce   : > { %v557_v28 = vpop.f32.mrf.mxu3 }
  0xcf   : > { %v558_v33 = vadd.f32 %v1439_v30, %v557_v28 }
  0xd0   : > { %v499_v48 = vpop.f32.mrf.mxu0 }
  0xd1   : > { %v500_v49 = vadd.f32 %v1439_v30, %v499_v48  ;;  %v595_v40 = vmax.f32 %v558_v33, 0.0  ;;  %v1269_v48 = vld [vmem:[%s1620_s5 + $0x8] sm:$0xff] }
  0xd2   : > { %894 = vmatpush.bf16.msra.mxu2 %v1269_v48  ;;  %1298 = vmatpush.bf16.msra.mxu3 %v1269_v48 }
  0xd3   : > { %v572_v51 = vmax.f32 %v500_v49, 0.0  ;;  %v1268_v49 = vld [vmem:[%s1620_s5] sm:$0xff] }
  0xd5   : > { %v601_v52 = vpack.c.bf16 %v572_v51, %v571_v50 }
  0xd6   : > { %v559_v36 = vpop.f32.mrf.mxu3  ;;  %895 = vmatpush.bf16.msra.mxu2 %v1268_v49  ;;  %1299 = vmatpush.bf16.msra.mxu3 %v1268_v49 }
  0xd7   : > { %701 = vmatmul.bf16.gmra.mxu1 %v601_v52  ;;  %v560_v41 = vadd.f32 %v1439_v30, %v559_v36 }
  0xd8   : > { %v502_v54 = vpop.f32.mrf.mxu0 }
  0xd9   : > { %v503_v55 = vadd.f32 %v1439_v30, %v502_v54  ;;  %v596_v43 = vmax.f32 %v560_v41, 0.0 }
  0xdb   : > { %541 = vmatmul.bf16.gmra.mxu0 %v1247_v53  ;;  %v573_v58 = vmax.f32 %v503_v55, 0.0  ;;  %v613_v45 = vpack.c.bf16 %v596_v43, %v595_v40 }
  0xdd   : > { %761 = vmatmul.bf16.gmra.mxu3 %v613_v45 }
  0xde   : > { %v562_v47 = vpop.f32.mrf.mxu3 }
  0xdf   : > { %v563_v51 = vadd.f32 %v1439_v30, %v562_v47 }
  0xe0   : > { %v504_v56 = vpop.f32.mrf.mxu0 }
  0xe1   : > { %v505_v57 = vadd.f32 %v1439_v30, %v504_v56 }
  0xe3   : > { %v574_v59 = vmax.f32 %v505_v57, 0.0  ;;  %v597_v57 = vmax.f32 %v563_v51, 0.0 }
  0xe5   : > { %v602_v60 = vpack.c.bf16 %v574_v59, %v573_v58 }
  0xe6   : > { %v564_v54 = vpop.f32.mrf.mxu3 }
  0xe7   : > { %706 = vmatmul.bf16.gmra.mxu1 %v602_v60  ;;  %v565_v58 = vadd.f32 %v1439_v30, %v564_v54 }
  0xe8   : > { %v507_v61 = vpop.f32.mrf.mxu0 }
  0xe9   : > { %v508_v63 = vadd.f32 %v1439_v30, %v507_v61  ;;  %v598_v60 = vmax.f32 %v565_v58, 0.0 }
  0xeb   : > { %v575_v4 = vmax.f32 %v508_v63, 0.0  ;;  %v614_v61 = vpack.c.bf16 %v598_v60, %v597_v57 }
  0xed   : > { %766 = vmatmul.bf16.gmra.mxu3 %v614_v61 }
  0xf0   : > { %v509_v1 = vpop.f32.mrf.mxu0 }
  0xf1   : > { %v510_v2 = vadd.f32 %v1439_v30, %v509_v1 }
  0xf3   : > { %v576_v5 = vmax.f32 %v510_v2, 0.0 }
  0xf5   : > { %v603_v8 = vpack.c.bf16 %v576_v5, %v575_v4 }
  0xf7   : > { %711 = vmatmul.bf16.gmra.mxu1 %v603_v8 }
  0xf8   : > { %v512_v11 = vpop.f32.mrf.mxu0 }
  0xf9   : > { %v513_v13 = vadd.f32 %v1439_v30, %v512_v11 }
  0xfb   : > { %v577_v19 = vmax.f32 %v513_v13, 0.0 }
 0x100   : > { %v514_v15 = vpop.f32.mrf.mxu0 }
 0x101   : > { %v515_v16 = vadd.f32 %v1439_v30, %v514_v15 }
 0x103   : > { %v578_v20 = vmax.f32 %v515_v16, 0.0 }
 0x105   : > { %v604_v23 = vpack.c.bf16 %v578_v20, %v577_v19 }
 0x107   : > { %716 = vmatmul.bf16.gmra.mxu1 %v604_v23 }
 0x108   : > { %v517_v27 = vpop.f32.mrf.mxu0 }
 0x109   : > { %v518_v32 = vadd.f32 %v1439_v30, %v517_v27 }
 0x10b   : > { %v579_v38 = vmax.f32 %v518_v32, 0.0 }
 0x110   : > { %v519_v34 = vpop.f32.mrf.mxu0 }
 0x111   : > { %v520_v35 = vadd.f32 %v1439_v30, %v519_v34 }
 0x113   : > { %v580_v39 = vmax.f32 %v520_v35, 0.0 }
 0x115   : > { %v605_v42 = vpack.c.bf16 %v580_v39, %v579_v38 }
 0x117   : > { %721 = vmatmul.bf16.gmra.mxu1 %v605_v42 }
 0x118   : > { %v522_v46 = vpop.f32.mrf.mxu0 }
 0x119   : > { %v523_v50 = vadd.f32 %v1439_v30, %v522_v46 }
 0x11b   : > { %v581_v55 = vmax.f32 %v523_v50, 0.0 }
 0x120   : > { %v524_v52 = vpop.f32.mrf.mxu0 }
 0x121   : > { %v525_v53 = vadd.f32 %v1439_v30, %v524_v52 }
 0x123   : > { %v582_v56 = vmax.f32 %v525_v53, 0.0 }
 0x125   : > { %v606_v59 = vpack.c.bf16 %v582_v56, %v581_v55 }
 0x127   : > { %726 = vmatmul.bf16.gmra.mxu1 %v606_v59 }
 0x128   : > { %v527_v62 = vpop.f32.mrf.mxu0 }
 0x129   : > { %v528_v63 = vadd.f32 %v1439_v30, %v527_v62 }
 0x12b   : > { %v583_v2 = vmax.f32 %v528_v63, 0.0 }
 0x130   : > { %v529_v0 = vpop.f32.mrf.mxu0 }
 0x131   : > { %v530_v1 = vadd.f32 %v1439_v30, %v529_v0 }
 0x133   : > { %v584_v3 = vmax.f32 %v530_v1, 0.0 }
 0x134   : > { %v692_v4 = vpop.f32.mrf.mxu1 }
 0x135   : > { %v607_v5 = vpack.c.bf16 %v584_v3, %v583_v2  ;;  %v693_v8 = vadd.f32 %v1497_v6, %v692_v4 }
 0x137   : > { %731 = vmatmul.bf16.gmra.mxu1 %v607_v5  ;;  %v772_v11 = vmax.f32 %v693_v8, 0.0 }
 0x138   : > { %v532_v7 = vpop.f32.mrf.mxu0 }
 0x139   : > { %v533_v12 = vadd.f32 %v1439_v30, %v532_v7 }
 0x13b   : > { %v585_v17 = vmax.f32 %v533_v12, 0.0 }
 0x13c   : > { %v694_v9 = vpop.f32.mrf.mxu1 }
 0x13d   : > { %v695_v10 = vadd.f32 %v1497_v6, %v694_v9 }
 0x13f   : > { %v773_v13 = vmax.f32 %v695_v10, 0.0 }
 0x140   : > { %v534_v14 = vpop.f32.mrf.mxu0  ;;  %v752_v58 = vpop.f32.mrf.mxu3 }
 0x141   : > { %v535_v15 = vadd.f32 %v1439_v30, %v534_v14  ;;  %v804_v16 = vpack.c.bf16 %v773_v13, %v772_v11  ;;  %v753_v63 = vadd.f32 %v1497_v6, %v752_v58 }
 0x143   : > { %v586_v18 = vmax.f32 %v535_v15, 0.0  ;;  %896 = vmatmul.bf16.vlgmr.msra.gmra.mxu2 %v804_v16  ;;  %v796_v2 = vmax.f32 %v753_v63, 0.0 }
 0x144   : > { %v697_v19 = vpop.f32.mrf.mxu1 }
 0x145   : > { %v608_v20 = vpack.c.bf16 %v586_v18, %v585_v17  ;;  %v698_v22 = vadd.f32 %v1497_v6, %v697_v19 }
 0x147   : > { %736 = vmatmul.bf16.gmra.mxu1 %v608_v20  ;;  %v774_v25 = vmax.f32 %v698_v22, 0.0 }
 0x148   : > { %v537_v21 = vpop.f32.mrf.mxu0  ;;  %v754_v1 = vpop.f32.mrf.mxu3 }
 0x149   : > { %v538_v26 = vadd.f32 %v1439_v30, %v537_v21  ;;  %v755_v3 = vadd.f32 %v1497_v6, %v754_v1 }
 0x14b   : > { %v587_v32 = vmax.f32 %v538_v26, 0.0  ;;  %v797_v4 = vmax.f32 %v755_v3, 0.0 }
 0x14c   : > { %v699_v23 = vpop.f32.mrf.mxu1 }
 0x14d   : > { %v700_v24 = vadd.f32 %v1497_v6, %v699_v23  ;;  %v816_v5 = vpack.c.bf16 %v797_v4, %v796_v2 }
 0x14f   : > { %v775_v27 = vmax.f32 %v700_v24, 0.0  ;;  %956 = vmatmul.bf16.vlgmr.msra.gmra.mxu3 %v816_v5 }
 0x150   : > { %v539_v28 = vpop.f32.mrf.mxu0  ;;  %v757_v9 = vpop.f32.mrf.mxu3 }
 0x151   : > { %v540_v29 = vadd.f32 %v1439_v30, %v539_v28  ;;  %v805_v31 = vpack.c.bf16 %v775_v27, %v774_v25  ;;  %v758_v14 = vadd.f32 %v1497_v6, %v757_v9 }
 0x153   : > { %v588_v33 = vmax.f32 %v540_v29, 0.0  ;;  %901 = vmatmul.bf16.gmra.mxu2 %v805_v31  ;;  %v798_v17 = vmax.f32 %v758_v14, 0.0 }
 0x154   : > { %v702_v34 = vpop.f32.mrf.mxu1 }
 0x155   : > { %v609_v35 = vpack.c.bf16 %v588_v33, %v587_v32  ;;  %v703_v37 = vadd.f32 %v1497_v6, %v702_v34 }
 0x157   : > { %741 = vmatmul.bf16.gmra.mxu1 %v609_v35  ;;  %v776_v40 = vmax.f32 %v703_v37, 0.0 }
 0x158   : > { %v542_v36 = vpop.f32.mrf.mxu0  ;;  %v759_v16 = vpop.f32.mrf.mxu3 }
 0x159   : > { %v543_v41 = vadd.f32 %v1439_v30, %v542_v36  ;;  %v760_v18 = vadd.f32 %v1497_v6, %v759_v16 }
 0x15b   : > { %v589_v46 = vmax.f32 %v543_v41, 0.0  ;;  %v799_v19 = vmax.f32 %v760_v18, 0.0 }
 0x15c   : > { %v704_v38 = vpop.f32.mrf.mxu1 }
 0x15d   : > { %v705_v39 = vadd.f32 %v1497_v6, %v704_v38  ;;  %v817_v20 = vpack.c.bf16 %v799_v19, %v798_v17 }
 0x15f   : > { %v777_v42 = vmax.f32 %v705_v39, 0.0  ;;  %961 = vmatmul.bf16.gmra.mxu3 %v817_v20 }
 0x160   : > { %v544_v43 = vpop.f32.mrf.mxu0  ;;  %v762_v23 = vpop.f32.mrf.mxu3 }
 0x161   : > { %v545_v44 = vadd.f32 %v1439_v30, %v544_v43  ;;  %v806_v45 = vpack.c.bf16 %v777_v42, %v776_v40  ;;  %v763_v28 = vadd.f32 %v1497_v6, %v762_v23 }
 0x163   : > { %v590_v47 = vmax.f32 %v545_v44, 0.0  ;;  %906 = vmatmul.bf16.gmra.mxu2 %v806_v45  ;;  %v800_v32 = vmax.f32 %v763_v28, 0.0 }
 0x164   : > { %v707_v48 = vpop.f32.mrf.mxu1 }
 0x165   : > { %v610_v49 = vpack.c.bf16 %v590_v47, %v589_v46  ;;  %v708_v50 = vadd.f32 %v1497_v6, %v707_v48 }
 0x167   : > { %746 = vmatmul.bf16.gmra.mxu1 %v610_v49  ;;  %v778_v53 = vmax.f32 %v708_v50, 0.0 }
 0x168   : > { %v764_v31 = vpop.f32.mrf.mxu3 }
 0x169   : > { %v765_v33 = vadd.f32 %v1497_v6, %v764_v31 }
 0x16b   : > { %v801_v34 = vmax.f32 %v765_v33, 0.0 }
 0x16c   : > { %v709_v51 = vpop.f32.mrf.mxu1 }
 0x16d   : > { %v710_v52 = vadd.f32 %v1497_v6, %v709_v51  ;;  %v818_v35 = vpack.c.bf16 %v801_v34, %v800_v32 }
 0x16f   : > { %v779_v54 = vmax.f32 %v710_v52, 0.0  ;;  %966 = vmatmul.bf16.gmra.mxu3 %v818_v35 }
 0x170   : > { %v767_v38 = vpop.f32.mrf.mxu3 }
 0x171   : > { %v807_v55 = vpack.c.bf16 %v779_v54, %v778_v53  ;;  %v768_v43 = vadd.f32 %v1497_v6, %v767_v38 }
 0x173   : > { %911 = vmatmul.bf16.gmra.mxu2 %v807_v55  ;;  %v802_v46 = vmax.f32 %v768_v43, 0.0 }
 0x174   : > { %v712_v56 = vpop.f32.mrf.mxu1 }
 0x175   : > { %v713_v57 = vadd.f32 %v1497_v6, %v712_v56  ;;  %v1535_v56 = vld [vmem:[%s1621_s6] ss:$0 sm:$0xff] }
 0x177   : > { %v780_v60 = vmax.f32 %v713_v57, 0.0 }
 0x178   : > { %v769_v45 = vpop.f32.mrf.mxu3 }
 0x179   : > { %v770_v47 = vadd.f32 %v1497_v6, %v769_v45 }
 0x17b   : > { %v803_v48 = vmax.f32 %v770_v47, 0.0 }
 0x17c   : > { %v714_v30 = vpop.f32.mrf.mxu1 }
 0x17d   : > { %v715_v59 = vadd.f32 %v1497_v6, %v714_v30  ;;  %v819_v49 = vpack.c.bf16 %v803_v48, %v802_v46 }
 0x17f   : > { %v781_v61 = vmax.f32 %v715_v59, 0.0  ;;  %971 = vmatmul.bf16.gmra.mxu3 %v819_v49 }
 0x181   : > { %v808_v62 = vpack.c.bf16 %v781_v61, %v780_v60 }
 0x183   : > { %916 = vmatmul.bf16.gmra.mxu2 %v808_v62 }
 0x184   : > { %v717_v0 = vpop.f32.mrf.mxu1 }
 0x185   : > { %v718_v7 = vadd.f32 %v1497_v6, %v717_v0 }
 0x187   : > { %v782_v11 = vmax.f32 %v718_v7, 0.0 }
 0x18c   : > { %v719_v8 = vpop.f32.mrf.mxu1 }
 0x18d   : > { %v720_v10 = vadd.f32 %v1497_v6, %v719_v8 }
 0x18f   : > { %v783_v12 = vmax.f32 %v720_v10, 0.0 }
 0x191   : > { %v809_v13 = vpack.c.bf16 %v783_v12, %v782_v11 }
 0x193   : > { %921 = vmatmul.bf16.gmra.mxu2 %v809_v13 }
 0x194   : > { %v722_v15 = vpop.f32.mrf.mxu1 }
 0x195   : > { %v723_v21 = vadd.f32 %v1497_v6, %v722_v15 }
 0x197   : > { %v784_v25 = vmax.f32 %v723_v21, 0.0 }
 0x19c   : > { %v724_v22 = vpop.f32.mrf.mxu1 }
 0x19d   : > { %v725_v24 = vadd.f32 %v1497_v6, %v724_v22 }
 0x19f   : > { %v785_v26 = vmax.f32 %v725_v24, 0.0 }
 0x1a1   : > { %v810_v27 = vpack.c.bf16 %v785_v26, %v784_v25 }
 0x1a3   : > { %926 = vmatmul.bf16.gmra.mxu2 %v810_v27 }
 0x1a4   : > { %v727_v29 = vpop.f32.mrf.mxu1 }
 0x1a5   : > { %v728_v36 = vadd.f32 %v1497_v6, %v727_v29 }
 0x1a7   : > { %v786_v40 = vmax.f32 %v728_v36, 0.0 }
 0x1ac   : > { %v729_v37 = vpop.f32.mrf.mxu1 }
 0x1ad   : > { %v730_v39 = vadd.f32 %v1497_v6, %v729_v37 }
 0x1af   : > { %v787_v41 = vmax.f32 %v730_v39, 0.0 }
 0x1b1   : > { %v811_v42 = vpack.c.bf16 %v787_v41, %v786_v40 }
 0x1b3   : > { %931 = vmatmul.bf16.gmra.mxu2 %v811_v42 }
 0x1b4   : > { %v732_v44 = vpop.f32.mrf.mxu1 }
 0x1b5   : > { %v733_v50 = vadd.f32 %v1497_v6, %v732_v44 }
 0x1b7   : > { %v788_v53 = vmax.f32 %v733_v50, 0.0 }
 0x1bc   : > { %v734_v51 = vpop.f32.mrf.mxu1 }
 0x1bd   : > { %v735_v52 = vadd.f32 %v1497_v6, %v734_v51 }
 0x1bf   : > { %v789_v54 = vmax.f32 %v735_v52, 0.0 }
 0x1c1   : > { %v812_v55 = vpack.c.bf16 %v789_v54, %v788_v53 }
 0x1c3   : > { %936 = vmatmul.bf16.gmra.mxu2 %v812_v55 }
 0x1c4   : > { %v737_v57 = vpop.f32.mrf.mxu1 }
 0x1c5   : > { %v738_v59 = vadd.f32 %v1497_v6, %v737_v57 }
 0x1c6   : > { %v897_v30 = vpop.f32.mrf.mxu2 }
 0x1c7   : > { %v898_v58 = vadd.f32 %v1535_v56, %v897_v30  ;;  %v790_v63 = vmax.f32 %v738_v59, 0.0 }
 0x1c9   : > { %977 = vst [vmem:[%s1540_s23] sm:$0xff] %v898_v58 }
 0x1cc   : > { %v739_v60 = vpop.f32.mrf.mxu1 }
 0x1cd   : > { %v740_v61 = vadd.f32 %v1497_v6, %v739_v60 }
 0x1ce   : > { %v899_v62 = vpop.f32.mrf.mxu2 }
 0x1cf   : > { %v791_v0 = vmax.f32 %v740_v61, 0.0  ;;  %v900_v1 = vadd.f32 %v1535_v56, %v899_v62 }
 0x1d1   : > { %978 = vst [vmem:[%s1540_s23 + $0x8] sm:$0xff] %v900_v1  ;;  %v813_v2 = vpack.c.bf16 %v791_v0, %v790_v63 }
 0x1d2   : > { %v957_v33 = vpop.f32.mrf.mxu3 }
 0x1d3   : > { %941 = vmatmul.bf16.gmra.mxu2 %v813_v2  ;;  %v958_v35 = vadd.f32 %v1535_v56, %v957_v33 }
 0x1d4   : > { %v742_v3 = vpop.f32.mrf.mxu1 }
 0x1d5   : > { %v743_v7 = vadd.f32 %v1497_v6, %v742_v3  ;;  %1001 = vst [vmem:[%s1540_s23 + $0xc0] sm:$0xff] %v958_v35 }
 0x1d6   : > { %v902_v4 = vpop.f32.mrf.mxu2 }
 0x1d7   : > { %v903_v5 = vadd.f32 %v1535_v56, %v902_v4  ;;  %v792_v11 = vmax.f32 %v743_v7, 0.0 }
 0x1d9   : > { %979 = vst [vmem:[%s1540_s23 + $0x10] sm:$0xff] %v903_v5 }
 0x1da   : > { %v959_v37 = vpop.f32.mrf.mxu3 }
 0x1db   : > { %v960_v39 = vadd.f32 %v1535_v56, %v959_v37 }
 0x1dc   : > { %v744_v8 = vpop.f32.mrf.mxu1 }
 0x1dd   : > { %v745_v9 = vadd.f32 %v1497_v6, %v744_v8  ;;  %1002 = vst [vmem:[%s1540_s23 + $0xc8] sm:$0xff] %v960_v39 }
 0x1de   : > { %v904_v10 = vpop.f32.mrf.mxu2 }
 0x1df   : > { %v793_v12 = vmax.f32 %v745_v9, 0.0  ;;  %v905_v13 = vadd.f32 %v1535_v56, %v904_v10 }
 0x1e1   : > { %980 = vst [vmem:[%s1540_s23 + $0x18] sm:$0xff] %v905_v13  ;;  %v814_v14 = vpack.c.bf16 %v793_v12, %v792_v11 }
 0x1e2   : > { %v962_v41 = vpop.f32.mrf.mxu3 }
 0x1e3   : > { %946 = vmatmul.bf16.gmra.mxu2 %v814_v14  ;;  %v963_v43 = vadd.f32 %v1535_v56, %v962_v41 }
 0x1e4   : > { %v747_v15 = vpop.f32.mrf.mxu1 }
 0x1e5   : > { %v748_v18 = vadd.f32 %v1497_v6, %v747_v15  ;;  %1003 = vst [vmem:[%s1540_s23 + $0xd0] sm:$0xff] %v963_v43 }
 0x1e6   : > { %v907_v16 = vpop.f32.mrf.mxu2 }
 0x1e7   : > { %v908_v17 = vadd.f32 %v1535_v56, %v907_v16  ;;  %v794_v22 = vmax.f32 %v748_v18, 0.0 }
 0x1e9   : > { %981 = vst [vmem:[%s1540_s23 + $0x20] sm:$0xff] %v908_v17 }
 0x1ea   : > { %v964_v45 = vpop.f32.mrf.mxu3 }
 0x1eb   : > { %v965_v47 = vadd.f32 %v1535_v56, %v964_v45 }
 0x1ec   : > { %v749_v19 = vpop.f32.mrf.mxu1 }
 0x1ed   : > { %v750_v20 = vadd.f32 %v1497_v6, %v749_v19  ;;  %1004 = vst [vmem:[%s1540_s23 + $0xd8] sm:$0xff] %v965_v47 }
 0x1ee   : > { %v909_v21 = vpop.f32.mrf.mxu2 }
 0x1ef   : > { %v795_v23 = vmax.f32 %v750_v20, 0.0  ;;  %v910_v24 = vadd.f32 %v1535_v56, %v909_v21 }
 0x1f1   : > { %982 = vst [vmem:[%s1540_s23 + $0x28] sm:$0xff] %v910_v24  ;;  %v815_v25 = vpack.c.bf16 %v795_v23, %v794_v22 }
 0x1f2   : > { %v967_v49 = vpop.f32.mrf.mxu3 }
 0x1f3   : > { %951 = vmatmul.bf16.gmra.mxu2 %v815_v25  ;;  %v968_v51 = vadd.f32 %v1535_v56, %v967_v49 }
 0x1f5   : > { %1005 = vst [vmem:[%s1540_s23 + $0xe0] sm:$0xff] %v968_v51 }
 0x1f6   : > { %v912_v26 = vpop.f32.mrf.mxu2 }
 0x1f7   : > { %v913_v27 = vadd.f32 %v1535_v56, %v912_v26 }
 0x1f9   : > { %983 = vst [vmem:[%s1540_s23 + $0x30] sm:$0xff] %v913_v27 }
 0x1fa   : > { %v969_v53 = vpop.f32.mrf.mxu3 }
 0x1fb   : > { %v970_v55 = vadd.f32 %v1535_v56, %v969_v53 }
 0x1fd   : > { %1006 = vst [vmem:[%s1540_s23 + $0xe8] sm:$0xff] %v970_v55 }
 0x1fe   : > { %v914_v28 = vpop.f32.mrf.mxu2 }
 0x1ff   : > { %v915_v29 = vadd.f32 %v1535_v56, %v914_v28 }
 0x201   : > { %984 = vst [vmem:[%s1540_s23 + $0x38] sm:$0xff] %v915_v29 }
 0x202   : > { %v972_v30 = vpop.f32.mrf.mxu3 }
 0x203   : > { %v973_v59 = vadd.f32 %v1535_v56, %v972_v30 }
 0x205   : > { %1007 = vst [vmem:[%s1540_s23 + $0xf0] sm:$0xff] %v973_v59 }
 0x206   : > { %v917_v6 = vpop.f32.mrf.mxu2 }
 0x207   : > { %v918_v31 = vadd.f32 %v1535_v56, %v917_v6 }
 0x209   : > { %985 = vst [vmem:[%s1540_s23 + $0x40] sm:$0xff] %v918_v31 }
 0x20a   : > { %v974_v61 = vpop.f32.mrf.mxu3 }
 0x20b   : > { %v975_v63 = vadd.f32 %v1535_v56, %v974_v61 }
 0x20d   : > { %1008 = vst [vmem:[%s1540_s23 + $0xf8] sm:$0xff] %v975_v63 }
 0x20e   : > { %v919_v32 = vpop.f32.mrf.mxu2 }
 0x20f   : > { %v920_v34 = vadd.f32 %v1535_v56, %v919_v32 }
 0x211   : > { %986 = vst [vmem:[%s1540_s23 + $0x48] sm:$0xff] %v920_v34 }
 0x216   : > { %v922_v36 = vpop.f32.mrf.mxu2 }
 0x217   : > { %v923_v38 = vadd.f32 %v1535_v56, %v922_v36 }
 0x219   : > { %987 = vst [vmem:[%s1540_s23 + $0x50] sm:$0xff] %v923_v38 }
 0x21e   : > { %v924_v40 = vpop.f32.mrf.mxu2 }
 0x21f   : > { %v925_v42 = vadd.f32 %v1535_v56, %v924_v40 }
 0x221   : > { %988 = vst [vmem:[%s1540_s23 + $0x58] sm:$0xff] %v925_v42 }
 0x226   : > { %v927_v44 = vpop.f32.mrf.mxu2 }
 0x227   : > { %v928_v46 = vadd.f32 %v1535_v56, %v927_v44 }
 0x229   : > { %989 = vst [vmem:[%s1540_s23 + $0x60] sm:$0xff] %v928_v46 }
 0x22e   : > { %v929_v48 = vpop.f32.mrf.mxu2 }
 0x22f   : > { %v930_v50 = vadd.f32 %v1535_v56, %v929_v48 }
 0x231   : > { %990 = vst [vmem:[%s1540_s23 + $0x68] sm:$0xff] %v930_v50 }
 0x236   : > { %v932_v52 = vpop.f32.mrf.mxu2 }
 0x237   : > { %v933_v54 = vadd.f32 %v1535_v56, %v932_v52 }
 0x239   : > { %991 = vst [vmem:[%s1540_s23 + $0x70] sm:$0xff] %v933_v54 }
 0x23e   : > { %v934_v57 = vpop.f32.mrf.mxu2 }
 0x23f   : > { %v935_v58 = vadd.f32 %v1535_v56, %v934_v57 }
 0x241   : > { %992 = vst [vmem:[%s1540_s23 + $0x78] sm:$0xff] %v935_v58 }
 0x246   : > { %v937_v60 = vpop.f32.mrf.mxu2 }
 0x247   : > { %v938_v62 = vadd.f32 %v1535_v56, %v937_v60 }
 0x249   : > { %993 = vst [vmem:[%s1540_s23 + $0x80] sm:$0xff] %v938_v62 }
 0x24e   : > { %v939_v0 = vpop.f32.mrf.mxu2 }
 0x24f   : > { %v940_v1 = vadd.f32 %v1535_v56, %v939_v0 }
 0x251   : > { %994 = vst [vmem:[%s1540_s23 + $0x88] sm:$0xff] %v940_v1 }
 0x256   : > { %v942_v2 = vpop.f32.mrf.mxu2 }
 0x257   : > { %v943_v3 = vadd.f32 %v1535_v56, %v942_v2 }
 0x259   : > { %995 = vst [vmem:[%s1540_s23 + $0x90] sm:$0xff] %v943_v3 }
 0x25e   : > { %v944_v4 = vpop.f32.mrf.mxu2 }
 0x25f   : > { %v945_v5 = vadd.f32 %v1535_v56, %v944_v4 }
 0x261   : > { %996 = vst [vmem:[%s1540_s23 + $0x98] sm:$0xff] %v945_v5 }
 0x266   : > { %v947_v7 = vpop.f32.mrf.mxu2 }
 0x267   : > { %v948_v8 = vadd.f32 %v1535_v56, %v947_v7 }
 0x269   : > { %997 = vst [vmem:[%s1540_s23 + $0xa0] sm:$0xff] %v948_v8 }
 0x26e   : > { %v949_v9 = vpop.f32.mrf.mxu2 }
 0x26f   : > { %v950_v10 = vadd.f32 %v1535_v56, %v949_v9 }
 0x271   : > { %998 = vst [vmem:[%s1540_s23 + $0xa8] sm:$0xff] %v950_v10 }
 0x276   : > { %v952_v11 = vpop.f32.mrf.mxu2 }
 0x277   : > { %v953_v12 = vadd.f32 %v1535_v56, %v952_v11 }
 0x279   : > { %999 = vst [vmem:[%s1540_s23 + $0xb0] sm:$0xff] %v953_v12 }
 0x27e   : > { %v954_v13 = vpop.f32.mrf.mxu2 }
 0x27f   : > { %v955_v14 = vadd.f32 %v1535_v56, %v954_v13 }
 0x281   : > { %1000 = vst [vmem:[%s1540_s23 + $0xb8] sm:$0xff] %v955_v14 }
 0x282 PF: > { %s17_s24 = sadd.s32 1, %s1317_s24  }
 0x283   : > { %p14_p4 = scmp.ge.s32.totalorder %s17_s24, 4  }
 0x285   :  { %16 = sbr.rel (!%p14_p4) target bundleno = 1 (0x1), region = 78 }

</bundles_post_ra>
